<compile_context>
chip_gen: v7x
topology: tpu7x:2x2x1
jax: 0.10.0
libtpu: 0.0.40
codegen_flags: <defaults>
</compile_context>

<pallas_src>
import jax
import jax.numpy as jnp
import numpy as np
from jax.experimental import pallas as pl
from jax.experimental.pallas import tpu as pltpu

BN_EPS = 1e-5


# ---------------------------------------------------------------------------
# Fused kernel: maxpool2x2 -> DWSG block 1 (shuffle/BN folded) -> DWSG block 2
# ---------------------------------------------------------------------------
def make_down_kernel(Ho, Wo, Cin, Cmid, Cout):
    WC1, WC2, WCo = Wo * Cin, Wo * Cmid, Wo * Cout
    f32 = jnp.float32

    def dw3x3_packed(pad_ref, wt, C, WC):
        """3x3 depthwise conv on a lane-packed (Ho, Wo*C) image.

        pad_ref : (Ho+2, WC) VMEM; rows 0 / Ho+1 are zero halo rows, rows 1..Ho = input.
        wt      : (3, 3, WC) f32; per-channel weights tiled across the Wo pixels of a row.
        """
        lane = jax.lax.broadcasted_iota(jnp.int32, (Ho, WC), 1)
        keep_l = lane >= C            # lanes whose wo-1 neighbour exists
        keep_r = lane < (WC - C)      # lanes whose wo+1 neighbour exists
        acc = jnp.zeros((Ho, WC), f32)
        for dh in range(3):                                   # static unroll, 9 taps total
            row = pad_ref[pl.ds(dh, Ho), :]                   # (Ho, WC), sublane-offset load
            # horizontal neighbours via XLU lane rotation + edge masking
            left = jnp.where(keep_l, pltpu.roll(row, shift=C, axis=1), 0.0)       # in[., wo-1]
            right = jnp.where(keep_r, pltpu.roll(row, shift=WC - C, axis=1), 0.0)  # in[., wo+1]
            acc = acc + left * wt[dh, 0].reshape(1, WC)
            acc = acc + row * wt[dh, 1].reshape(1, WC)
            acc = acc + right * wt[dh, 2].reshape(1, WC)
        return acc

    def kernel(x_ref,            # (1, 2, 2, Ho, Wo*Cin)  pool parities x packed rows
               wd1_ref,          # (3, 3, Wo*Cin)         depthwise w, BN1 scale + shuffle folded, pixel-tiled
               b1a_ref,          # (1, Wo*Cin)
               w1_ref,           # (Wo*Cin, Wo*Cmid)      kron(I_Wo, blockdiag 1x1), BN2 scale folded
               b1b_ref,          # (1, Wo*Cmid)
               wd2_ref,          # (3, 3, Wo*Cmid)
               b2a_ref,          # (1, Wo*Cmid)
               w2_ref,           # (Wo*Cmid, Wo*Cout)
               b2b_ref,          # (1, Wo*Cout)
               o_ref,            # (1, Ho, Wo*Cout)
               pad1_ref,         # VMEM (Ho+2, Wo*Cin)    vertical halo buffer, block 1
               pad2_ref):        # VMEM (Ho+2, Wo*Cmid)   vertical halo buffer, block 2
        # ---------------- 2x2 max pool: 3 full-vreg maxima ----------------
        x00 = x_ref[0, 0, 0, :, :].astype(f32)      # h even, w even   (Ho, WC1)
        x01 = x_ref[0, 0, 1, :, :].astype(f32)      # h even, w odd
        x10 = x_ref[0, 1, 0, :, :].astype(f32)      # h odd,  w even
        x11 = x_ref[0, 1, 1, :, :].astype(f32)      # h odd,  w odd
        pooled = jnp.maximum(jnp.maximum(x00, x01), jnp.maximum(x10, x11))

        # ---------------- DWSG block 1 (channel_shuffle + BN scales pre-folded) ----------
        zero_row1 = jnp.zeros((1, WC1), f32)
        pad1_ref[pl.ds(0, 1), :] = zero_row1          # only the 2 halo rows are re-zeroed;
        pad1_ref[pl.ds(Ho + 1, 1), :] = zero_row1     # interior is fully rewritten each step
        pad1_ref[pl.ds(1, Ho), :] = pooled

        acc1 = dw3x3_packed(pad1_ref, wd1_ref[...].astype(f32), Cin, WC1)
        y1 = jnp.maximum(acc1 + b1a_ref[...], 0.0)                        # (Ho, WC1)

        # grouped 1x1 + BN + ReLU as one MXU matmul, staying in the packed layout
        z1 = jnp.dot(y1, w1_ref[...].astype(f32), preferred_element_type=f32)
        z1 = jnp.maximum(z1 + b1b_ref[...], 0.0)                          # (Ho, WC2)

        # ---------------- DWSG block 2 -----------------------------------------------------
        zero_row2 = jnp.zeros((1, WC2), f32)
        pad2_ref[pl.ds(0, 1), :] = zero_row2
        pad2_ref[pl.ds(Ho + 1, 1), :] = zero_row2
        pad2_ref[pl.ds(1, Ho), :] = z1

        acc2 = dw3x3_packed(pad2_ref, wd2_ref[...].astype(f32), Cmid, WC2)
        y2 = jnp.maximum(acc2 + b2a_ref[...], 0.0)                        # (Ho, WC2)

        z2 = jnp.dot(y2, w2_ref[...].astype(f32), preferred_element_type=f32)
        z2 = jnp.maximum(z2 + b2b_ref[...], 0.0)                          # (Ho, WCo)

        o_ref[0, :, :] = z2.astype(o_ref.dtype)       # single lane-dense store

    return kernel


def fused_down(x_nhwc, wd1_t, b1a_t, w1_k, b1b_t, wd2_t, b2a_t, w2_k, b2b_t):
    N, H, W, Cin = x_nhwc.shape
    assert H % 2 == 0 and W % 2 == 0, "MaxPool2d(2) kernel assumes even H, W"
    Ho, Wo = H // 2, W // 2
    WC1 = Wo * Cin
    WC2 = w1_k.shape[1]
    WCo = w2_k.shape[1]
    Cmid, Cout = WC2 // Wo, WCo // Wo

    # Layout plumbing only (no compute): split the 2x2 pool parities and pack (Wo, Cin)
    # into a single lane-dense axis.  XLA folds this into the NCHW->NHWC relayout copy.
    xp = x_nhwc.reshape(N, Ho, 2, Wo, 2, Cin).transpose(0, 2, 4, 1, 3, 5)
    xp = xp.reshape(N, 2, 2, Ho, WC1)

    kernel = make_down_kernel(Ho, Wo, Cin, Cmid, Cout)
    out = pl.pallas_call(
        kernel,
        out_shape=jax.ShapeDtypeStruct((N, Ho, WCo), x_nhwc.dtype),
        grid=(N,),
        in_specs=[
            pl.BlockSpec((1, 2, 2, Ho, WC1), lambda n: (n, 0, 0, 0, 0)),
            pl.BlockSpec((3, 3, WC1), lambda n: (0, 0, 0)),
            pl.BlockSpec((1, WC1), lambda n: (0, 0)),
            pl.BlockSpec((WC1, WC2), lambda n: (0, 0)),
            pl.BlockSpec((1, WC2), lambda n: (0, 0)),
            pl.BlockSpec((3, 3, WC2), lambda n: (0, 0, 0)),
            pl.BlockSpec((1, WC2), lambda n: (0, 0)),
            pl.BlockSpec((WC2, WCo), lambda n: (0, 0)),
            pl.BlockSpec((1, WCo), lambda n: (0, 0)),
        ],
        out_specs=pl.BlockSpec((1, Ho, WCo), lambda n: (n, 0, 0)),
        scratch_shapes=[
            pltpu.VMEM((Ho + 2, WC1), jnp.float32),
            pltpu.VMEM((Ho + 2, WC2), jnp.float32),
        ],
        compiler_params=pltpu.CompilerParams(dimension_semantics=("parallel",)),
    )(xp, wd1_t, b1a_t, w1_k, b1b_t, wd2_t, b2a_t, w2_k, b2b_t)
    return out.reshape(N, Ho, Wo, Cout)   # unpack lanes back to NHWC


# ---------------------------------------------------------------------------
# Host-side parameter prep (done once): BN fold, shuffle fold, lane packing
# ---------------------------------------------------------------------------
def fold_bn(gamma, beta, mean, var, eps=BN_EPS):
    scale = gamma / jnp.sqrt(var + eps)
    return scale, beta - mean * scale


def blockdiag_1x1(w_torch, groups):
    # [Cout, Cin//groups, 1, 1] grouped 1x1 conv -> dense block-diagonal [Cin, Cout]
    Cout, cig = w_torch.shape[0], w_torch.shape[1]
    cog = Cout // groups
    Cin = cig * groups
    full = jnp.zeros((Cin, Cout), w_torch.dtype)
    for g in range(groups):
        blk = w_torch[g * cog:(g + 1) * cog, :, 0, 0].T          # [cig, cog]
        full = full.at[g * cig:(g + 1) * cig, g * cog:(g + 1) * cog].set(blk)
    return full


def dw_to_hwc(wd_torch):
    # [C, 1, 3, 3] -> [3, 3, C]
    return jnp.transpose(wd_torch[:, 0], (1, 2, 0))


def shuffle_perm(c, groups=2):
    # channel_shuffle: shuffled[:, j] = x[:, perm[j]]
    j = np.arange(c)
    return (j % groups) * (c // groups) + (j // groups)


def prep_params(Wo, wd1, bn1a, w1, bn1b, wd2, bn2a, w2, bn2b, groups=4):
    Cin = wd1.shape[0]
    sc1a, bi1a = fold_bn(*bn1a)
    sc1b, bi1b = fold_bn(*bn1b)
    sc2a, bi2a = fold_bn(*bn2a)
    sc2b, bi2b = fold_bn(*bn2b)

    wd1_f = dw_to_hwc(wd1) * sc1a                       # BN1 scale -> depthwise weights
    wd2_f = dw_to_hwc(wd2) * sc2a
    w1_f = blockdiag_1x1(w1, groups) * sc1b[None, :]    # BN2 scale -> 1x1 weight columns
    w2_f = blockdiag_1x1(w2, groups) * sc2b[None, :]

    inv = np.argsort(shuffle_perm(Cin, 2))              # channel_shuffle(g=2) into block 1
    wd1_f = wd1_f[:, :, inv]
    b1a_f = bi1a[inv]
    w1_f = w1_f[inv, :]

    eye = jnp.eye(Wo, dtype=jnp.float32)
    return (jnp.tile(wd1_f, (1, 1, Wo)),                # (3,3,Wo*Cin)  pixel-tiled
            jnp.tile(b1a_f, Wo).reshape(1, -1),
            jnp.kron(eye, w1_f),                        # (Wo*Cin, Wo*Cmid) per-pixel block diag
            jnp.tile(bi1b, Wo).reshape(1, -1),
            jnp.tile(wd2_f, (1, 1, Wo)),
            jnp.tile(bi2a, Wo).reshape(1, -1),
            jnp.kron(eye, w2_f),
            jnp.tile(bi2b, Wo).reshape(1, -1))


# ---------------------------------------------------------------------------
# Reference (pure JAX / lax, un-folded params) for validation
# ---------------------------------------------------------------------------
def ref_dwsg(x_nhwc, wd_torch, bn_a, w_torch, bn_b, groups=4):
    Cin = x_nhwc.shape[-1]
    k_dw = jnp.transpose(wd_torch, (2, 3, 1, 0))                 # HWIO [3,3,1,Cin]
    y = jax.lax.conv_general_dilated(
        x_nhwc, k_dw, (1, 1), 'SAME',
        dimension_numbers=('NHWC', 'HWIO', 'NHWC'),
        feature_group_count=Cin, precision=jax.lax.Precision.HIGHEST)
    y = jax.nn.relu(y * bn_a[0] + bn_a[1])
    k_pw = jnp.transpose(w_torch, (2, 3, 1, 0))                  # HWIO [1,1,Cin//g,Cout]
    z = jax.lax.conv_general_dilated(
        y, k_pw, (1, 1), 'SAME',
        dimension_numbers=('NHWC', 'HWIO', 'NHWC'),
        feature_group_count=groups, precision=jax.lax.Precision.HIGHEST)
    return jax.nn.relu(z * bn_b[0] + bn_b[1])


# ---------------------------------------------------------------------------
# Main
# ---------------------------------------------------------------------------
if __name__ == "__main__":
    # Down(in_channels=16, out_channels=16): mid = out = 16, so all packed widths = Wo*C = 128.
    N, Cin, H, W = 2, 16, 16, 16
    Cout = 16
    GROUPS = 4

    key = jax.random.PRNGKey(0)
    ks = jax.random.split(key, 21)
    x_nchw = jax.random.normal(ks[0], (N, Cin, H, W), jnp.float32)

    # deterministic synthetic parameters (shapes from the module __init__)
    wd1 = jax.random.normal(ks[1], (Cin, 1, 3, 3), jnp.float32) * 0.3
    bn1a = (jax.random.normal(ks[2], (Cin,)) * 0.1 + 1.0,
            jax.random.normal(ks[3], (Cin,)) * 0.1,
            jax.random.normal(ks[4], (Cin,)) * 0.1,
            jax.random.uniform(ks[5], (Cin,), minval=0.5, maxval=1.5))
    w1 = jax.random.normal(ks[6], (Cout, Cin // GROUPS, 1, 1), jnp.float32) * 0.3
    bn1b = (jax.random.normal(ks[7], (Cout,)) * 0.1 + 1.0,
            jax.random.normal(ks[8], (Cout,)) * 0.1,
            jax.random.normal(ks[9], (Cout,)) * 0.1,
            jax.random.uniform(ks[10], (Cout,), minval=0.5, maxval=1.5))
    wd2 = jax.random.normal(ks[11], (Cout, 1, 3, 3), jnp.float32) * 0.3
    bn2a = (jax.random.normal(ks[12], (Cout,)) * 0.1 + 1.0,
            jax.random.normal(ks[13], (Cout,)) * 0.1,
            jax.random.normal(ks[14], (Cout,)) * 0.1,
            jax.random.uniform(ks[15], (Cout,), minval=0.5, maxval=1.5))
    w2 = jax.random.normal(ks[16], (Cout, Cout // GROUPS, 1, 1), jnp.float32) * 0.3
    bn2b = (jax.random.normal(ks[17], (Cout,)) * 0.1 + 1.0,
            jax.random.normal(ks[18], (Cout,)) * 0.1,
            jax.random.normal(ks[19], (Cout,)) * 0.1,
            jax.random.uniform(ks[20], (Cout,), minval=0.5, maxval=1.5))

    params = prep_params(W // 2, wd1, bn1a, w1, bn1b, wd2, bn2a, w2, bn2b, GROUPS)

    @jax.jit
    def down_forward(x):
        # NCHW -> NHWC boundary relayout (module spec is NCHW); everything else is one kernel.
        y = jnp.transpose(x, (0, 2, 3, 1))
        y = fused_down(y, *params)
        return jnp.transpose(y, (0, 3, 1, 2))

    out = jax.block_until_ready(down_forward(x_nchw))

    # independent reference: lax convs, explicit shuffle, un-folded weights
    sc1a, bi1a = fold_bn(*bn1a)
    sc1b, bi1b = fold_bn(*bn1b)
    sc2a, bi2a = fold_bn(*bn2a)
    sc2b, bi2b = fold_bn(*bn2b)

    def ref_down(x):
        n_, c_, h_, w_ = x.shape
        y = x.reshape(n_, c_, h_ // 2, 2, w_ // 2, 2).max(axis=(3, 5))     # MaxPool2d(2)
        g = 2                                                              # channel_shuffle
        y = y.reshape(n_, g, c_ // g, h_ // 2, w_ // 2).transpose(0, 2, 1, 3, 4)
        y = y.reshape(n_, c_, h_ // 2, w_ // 2)
        y = jnp.transpose(y, (0, 2, 3, 1))
        y = ref_dwsg(y, wd1, (sc1a, bi1a), w1, (sc1b, bi1b), GROUPS)
        y = ref_dwsg(y, wd2, (sc2a, bi2a), w2, (sc2b, bi2b), GROUPS)
        return jnp.transpose(y, (0, 3, 1, 2))

    ref = jax.block_until_ready(ref_down(x_nchw))
    np.testing.assert_allclose(np.asarray(out), np.asarray(ref), rtol=1e-2, atol=1e-2)

    assert out.shape == (N, Cout, H // 2, W // 2)
    print("KERNEL_OK")
</pallas_src>

<mosaic_0001>
module attributes {stable_mosaic.version = 11 : i64} {
  func.func @kernel(%arg0: i32, %arg1: memref<1x2x2x8x128xf32, #tpu.memory_space<vmem>>, %arg2: memref<3x3x128xf32, #tpu.memory_space<vmem>>, %arg3: memref<1x128xf32, #tpu.memory_space<vmem>>, %arg4: memref<128x128xf32, #tpu.memory_space<vmem>>, %arg5: memref<1x128xf32, #tpu.memory_space<vmem>>, %arg6: memref<3x3x128xf32, #tpu.memory_space<vmem>>, %arg7: memref<1x128xf32, #tpu.memory_space<vmem>>, %arg8: memref<128x128xf32, #tpu.memory_space<vmem>>, %arg9: memref<1x128xf32, #tpu.memory_space<vmem>>, %arg10: memref<1x8x128xf32, #tpu.memory_space<vmem>>, %arg11: memref<10x128xf32, #tpu.memory_space<vmem>>, %arg12: memref<10x128xf32, #tpu.memory_space<vmem>>) attributes {dimension_semantics = [#tpu.dimension_semantics<parallel>], iteration_bounds = array<i64: 2>, scalar_prefetch = 0 : i64, scratch_operands = 2 : i64, tpu.core_type = #tpu.core_type<tc>, window_params = [{transform_indices = @transform_0, window_bounds = array<i64: 1, 2, 2, 8, 128>}, {pipeline_mode = #tpu.pipeline_mode<synchronous>, transform_indices = @transform_1, window_bounds = array<i64: 3, 3, 128>}, {pipeline_mode = #tpu.pipeline_mode<synchronous>, transform_indices = @transform_2, window_bounds = array<i64: 1, 128>}, {pipeline_mode = #tpu.pipeline_mode<synchronous>, transform_indices = @transform_3, window_bounds = array<i64: 128, 128>}, {pipeline_mode = #tpu.pipeline_mode<synchronous>, transform_indices = @transform_4, window_bounds = array<i64: 1, 128>}, {pipeline_mode = #tpu.pipeline_mode<synchronous>, transform_indices = @transform_5, window_bounds = array<i64: 3, 3, 128>}, {pipeline_mode = #tpu.pipeline_mode<synchronous>, transform_indices = @transform_6, window_bounds = array<i64: 1, 128>}, {pipeline_mode = #tpu.pipeline_mode<synchronous>, transform_indices = @transform_7, window_bounds = array<i64: 128, 128>}, {pipeline_mode = #tpu.pipeline_mode<synchronous>, transform_indices = @transform_8, window_bounds = array<i64: 1, 128>}, {transform_indices = @transform_9, window_bounds = array<i64: 1, 8, 128>}]} {
    %c0 = arith.constant 0 : index
    %c0_0 = arith.constant 0 : index
    %c0_1 = arith.constant 0 : index
    %c0_2 = arith.constant 0 : index
    %c0_3 = arith.constant 0 : index
    %0 = vector.load %arg1[%c0, %c0_0, %c0_1, %c0_2, %c0_3] : memref<1x2x2x8x128xf32, #tpu.memory_space<vmem>>, vector<1x1x1x8x128xf32>
    %1 = vector.shape_cast %0 : vector<1x1x1x8x128xf32> to vector<8x128xf32>
    %c0_4 = arith.constant 0 : index
    %c0_5 = arith.constant 0 : index
    %c1 = arith.constant 1 : index
    %c0_6 = arith.constant 0 : index
    %c0_7 = arith.constant 0 : index
    %2 = vector.load %arg1[%c0_4, %c0_5, %c1, %c0_6, %c0_7] : memref<1x2x2x8x128xf32, #tpu.memory_space<vmem>>, vector<1x1x1x8x128xf32>
    %3 = vector.shape_cast %2 : vector<1x1x1x8x128xf32> to vector<8x128xf32>
    %c0_8 = arith.constant 0 : index
    %c1_9 = arith.constant 1 : index
    %c0_10 = arith.constant 0 : index
    %c0_11 = arith.constant 0 : index
    %c0_12 = arith.constant 0 : index
    %4 = vector.load %arg1[%c0_8, %c1_9, %c0_10, %c0_11, %c0_12] : memref<1x2x2x8x128xf32, #tpu.memory_space<vmem>>, vector<1x1x1x8x128xf32>
    %5 = vector.shape_cast %4 : vector<1x1x1x8x128xf32> to vector<8x128xf32>
    %c0_13 = arith.constant 0 : index
    %c1_14 = arith.constant 1 : index
    %c1_15 = arith.constant 1 : index
    %c0_16 = arith.constant 0 : index
    %c0_17 = arith.constant 0 : index
    %6 = vector.load %arg1[%c0_13, %c1_14, %c1_15, %c0_16, %c0_17] : memref<1x2x2x8x128xf32, #tpu.memory_space<vmem>>, vector<1x1x1x8x128xf32>
    %7 = vector.shape_cast %6 : vector<1x1x1x8x128xf32> to vector<8x128xf32>
    %8 = arith.maximumf %1, %3 : vector<8x128xf32>
    %9 = arith.maximumf %5, %7 : vector<8x128xf32>
    %10 = arith.maximumf %8, %9 : vector<8x128xf32>
    %cst = arith.constant 0.000000e+00 : f32
    %11 = vector.broadcast %cst : f32 to vector<1x128xf32>
    %c0_18 = arith.constant 0 : index
    %c0_19 = arith.constant 0 : index
    %12 = vector.load %arg11[%c0_18, %c0_19] : memref<10x128xf32, #tpu.memory_space<vmem>>, vector<1x128xf32>
    tpu.vector_store %arg11[%c0_18, %c0_19], %11 {strides = array<i32>} : memref<10x128xf32, #tpu.memory_space<vmem>>, vector<1x128xf32>,
    %c9 = arith.constant 9 : index
    %c0_20 = arith.constant 0 : index
    %13 = vector.load %arg11[%c9, %c0_20] : memref<10x128xf32, #tpu.memory_space<vmem>>, vector<1x128xf32>
    tpu.vector_store %arg11[%c9, %c0_20], %11 {strides = array<i32>} : memref<10x128xf32, #tpu.memory_space<vmem>>, vector<1x128xf32>,
    %c1_21 = arith.constant 1 : index
    %c0_22 = arith.constant 0 : index
    %14 = vector.load %arg11[%c1_21, %c0_22] : memref<10x128xf32, #tpu.memory_space<vmem>>, vector<8x128xf32>
    tpu.vector_store %arg11[%c1_21, %c0_22], %10 {strides = array<i32>} : memref<10x128xf32, #tpu.memory_space<vmem>>, vector<8x128xf32>,
    %c0_23 = arith.constant 0 : index
    %c0_24 = arith.constant 0 : index
    %c0_25 = arith.constant 0 : index
    %15 = vector.load %arg2[%c0_23, %c0_24, %c0_25] : memref<3x3x128xf32, #tpu.memory_space<vmem>>, vector<3x3x128xf32>
    %16 = tpu.iota {dimensions = array<i32: 1>} : vector<8x128xi32>
    %c16_i32 = arith.constant 16 : i32
    %17 = vector.broadcast %c16_i32 : i32 to vector<8x128xi32>
    %18 = arith.cmpi sge, %16, %17 : vector<8x128xi32>
    %c112_i32 = arith.constant 112 : i32
    %19 = vector.broadcast %c112_i32 : i32 to vector<8x128xi32>
    %20 = arith.cmpi slt, %16, %19 : vector<8x128xi32>
    %cst_26 = arith.constant 0.000000e+00 : f32
    %21 = vector.broadcast %cst_26 : f32 to vector<8x128xf32>
    %c0_27 = arith.constant 0 : index
    %c0_28 = arith.constant 0 : index
    %22 = vector.load %arg11[%c0_27, %c0_28] : memref<10x128xf32, #tpu.memory_space<vmem>>, vector<8x128xf32>
    %c16_i32_29 = arith.constant 16 : i32
    %23 = tpu.dynamic_rotate %22 by %c16_i32_29 dim 1 : vector<8x128xf32>, i32 -> vector<8x128xf32>
    %cst_30 = arith.constant 0.000000e+00 : f32
    %24 = vector.broadcast %cst_30 : f32 to vector<8x128xf32>
    %25 = arith.select %18, %23, %24 : vector<8x128xi1>, vector<8x128xf32>
    %c112_i32_31 = arith.constant 112 : i32
    %26 = tpu.dynamic_rotate %22 by %c112_i32_31 dim 1 : vector<8x128xf32>, i32 -> vector<8x128xf32>
    %cst_32 = arith.constant 0.000000e+00 : f32
    %27 = vector.broadcast %cst_32 : f32 to vector<8x128xf32>
    %28 = arith.select %20, %26, %27 : vector<8x128xi1>, vector<8x128xf32>
    %29 = vector.extract_strided_slice %15 {offsets = [0, 0, 0], sizes = [1, 1, 128], strides = [1, 1, 1]} : vector<3x3x128xf32> to vector<1x1x128xf32>
    %30 = vector.shape_cast %29 : vector<1x1x128xf32> to vector<128xf32>
    %31 = vector.shape_cast %30 : vector<128xf32> to vector<1x128xf32>
    %32 = vector.broadcast %31 : vector<1x128xf32> to vector<8x128xf32>
    %33 = arith.mulf %25, %32 : vector<8x128xf32>
    %34 = arith.addf %21, %33 : vector<8x128xf32>
    %35 = vector.extract_strided_slice %15 {offsets = [0, 1, 0], sizes = [1, 1, 128], strides = [1, 1, 1]} : vector<3x3x128xf32> to vector<1x1x128xf32>
    %36 = vector.shape_cast %35 : vector<1x1x128xf32> to vector<128xf32>
    %37 = vector.shape_cast %36 : vector<128xf32> to vector<1x128xf32>
    %38 = vector.broadcast %37 : vector<1x128xf32> to vector<8x128xf32>
    %39 = arith.mulf %22, %38 : vector<8x128xf32>
    %40 = arith.addf %34, %39 : vector<8x128xf32>
    %41 = vector.extract_strided_slice %15 {offsets = [0, 2, 0], sizes = [1, 1, 128], strides = [1, 1, 1]} : vector<3x3x128xf32> to vector<1x1x128xf32>
    %42 = vector.shape_cast %41 : vector<1x1x128xf32> to vector<128xf32>
    %43 = vector.shape_cast %42 : vector<128xf32> to vector<1x128xf32>
    %44 = vector.broadcast %43 : vector<1x128xf32> to vector<8x128xf32>
    %45 = arith.mulf %28, %44 : vector<8x128xf32>
    %46 = arith.addf %40, %45 : vector<8x128xf32>
    %c1_33 = arith.constant 1 : index
    %c0_34 = arith.constant 0 : index
    %47 = vector.load %arg11[%c1_33, %c0_34] : memref<10x128xf32, #tpu.memory_space<vmem>>, vector<8x128xf32>
    %c16_i32_35 = arith.constant 16 : i32
    %48 = tpu.dynamic_rotate %47 by %c16_i32_35 dim 1 : vector<8x128xf32>, i32 -> vector<8x128xf32>
    %cst_36 = arith.constant 0.000000e+00 : f32
    %49 = vector.broadcast %cst_36 : f32 to vector<8x128xf32>
    %50 = arith.select %18, %48, %49 : vector<8x128xi1>, vector<8x128xf32>
    %c112_i32_37 = arith.constant 112 : i32
    %51 = tpu.dynamic_rotate %47 by %c112_i32_37 dim 1 : vector<8x128xf32>, i32 -> vector<8x128xf32>
    %cst_38 = arith.constant 0.000000e+00 : f32
    %52 = vector.broadcast %cst_38 : f32 to vector<8x128xf32>
    %53 = arith.select %20, %51, %52 : vector<8x128xi1>, vector<8x128xf32>
    %54 = vector.extract_strided_slice %15 {offsets = [1, 0, 0], sizes = [1, 1, 128], strides = [1, 1, 1]} : vector<3x3x128xf32> to vector<1x1x128xf32>
    %55 = vector.shape_cast %54 : vector<1x1x128xf32> to vector<128xf32>
    %56 = vector.shape_cast %55 : vector<128xf32> to vector<1x128xf32>
    %57 = vector.broadcast %56 : vector<1x128xf32> to vector<8x128xf32>
    %58 = arith.mulf %50, %57 : vector<8x128xf32>
    %59 = arith.addf %46, %58 : vector<8x128xf32>
    %60 = vector.extract_strided_slice %15 {offsets = [1, 1, 0], sizes = [1, 1, 128], strides = [1, 1, 1]} : vector<3x3x128xf32> to vector<1x1x128xf32>
    %61 = vector.shape_cast %60 : vector<1x1x128xf32> to vector<128xf32>
    %62 = vector.shape_cast %61 : vector<128xf32> to vector<1x128xf32>
    %63 = vector.broadcast %62 : vector<1x128xf32> to vector<8x128xf32>
    %64 = arith.mulf %47, %63 : vector<8x128xf32>
    %65 = arith.addf %59, %64 : vector<8x128xf32>
    %66 = vector.extract_strided_slice %15 {offsets = [1, 2, 0], sizes = [1, 1, 128], strides = [1, 1, 1]} : vector<3x3x128xf32> to vector<1x1x128xf32>
    %67 = vector.shape_cast %66 : vector<1x1x128xf32> to vector<128xf32>
    %68 = vector.shape_cast %67 : vector<128xf32> to vector<1x128xf32>
    %69 = vector.broadcast %68 : vector<1x128xf32> to vector<8x128xf32>
    %70 = arith.mulf %53, %69 : vector<8x128xf32>
    %71 = arith.addf %65, %70 : vector<8x128xf32>
    %c2 = arith.constant 2 : index
    %c0_39 = arith.constant 0 : index
    %72 = vector.load %arg11[%c2, %c0_39] : memref<10x128xf32, #tpu.memory_space<vmem>>, vector<8x128xf32>
    %c16_i32_40 = arith.constant 16 : i32
    %73 = tpu.dynamic_rotate %72 by %c16_i32_40 dim 1 : vector<8x128xf32>, i32 -> vector<8x128xf32>
    %cst_41 = arith.constant 0.000000e+00 : f32
    %74 = vector.broadcast %cst_41 : f32 to vector<8x128xf32>
    %75 = arith.select %18, %73, %74 : vector<8x128xi1>, vector<8x128xf32>
    %c112_i32_42 = arith.constant 112 : i32
    %76 = tpu.dynamic_rotate %72 by %c112_i32_42 dim 1 : vector<8x128xf32>, i32 -> vector<8x128xf32>
    %cst_43 = arith.constant 0.000000e+00 : f32
    %77 = vector.broadcast %cst_43 : f32 to vector<8x128xf32>
    %78 = arith.select %20, %76, %77 : vector<8x128xi1>, vector<8x128xf32>
    %79 = vector.extract_strided_slice %15 {offsets = [2, 0, 0], sizes = [1, 1, 128], strides = [1, 1, 1]} : vector<3x3x128xf32> to vector<1x1x128xf32>
    %80 = vector.shape_cast %79 : vector<1x1x128xf32> to vector<128xf32>
    %81 = vector.shape_cast %80 : vector<128xf32> to vector<1x128xf32>
    %82 = vector.broadcast %81 : vector<1x128xf32> to vector<8x128xf32>
    %83 = arith.mulf %75, %82 : vector<8x128xf32>
    %84 = arith.addf %71, %83 : vector<8x128xf32>
    %85 = vector.extract_strided_slice %15 {offsets = [2, 1, 0], sizes = [1, 1, 128], strides = [1, 1, 1]} : vector<3x3x128xf32> to vector<1x1x128xf32>
    %86 = vector.shape_cast %85 : vector<1x1x128xf32> to vector<128xf32>
    %87 = vector.shape_cast %86 : vector<128xf32> to vector<1x128xf32>
    %88 = vector.broadcast %87 : vector<1x128xf32> to vector<8x128xf32>
    %89 = arith.mulf %72, %88 : vector<8x128xf32>
    %90 = arith.addf %84, %89 : vector<8x128xf32>
    %91 = vector.extract_strided_slice %15 {offsets = [2, 2, 0], sizes = [1, 1, 128], strides = [1, 1, 1]} : vector<3x3x128xf32> to vector<1x1x128xf32>
    %92 = vector.shape_cast %91 : vector<1x1x128xf32> to vector<128xf32>
    %93 = vector.shape_cast %92 : vector<128xf32> to vector<1x128xf32>
    %94 = vector.broadcast %93 : vector<1x128xf32> to vector<8x128xf32>
    %95 = arith.mulf %78, %94 : vector<8x128xf32>
    %96 = arith.addf %90, %95 : vector<8x128xf32>
    %c0_44 = arith.constant 0 : index
    %c0_45 = arith.constant 0 : index
    %97 = vector.load %arg3[%c0_44, %c0_45] : memref<1x128xf32, #tpu.memory_space<vmem>>, vector<1x128xf32>
    %98 = vector.broadcast %97 : vector<1x128xf32> to vector<8x128xf32>
    %99 = arith.addf %96, %98 : vector<8x128xf32>
    %cst_46 = arith.constant 0.000000e+00 : f32
    %100 = vector.broadcast %cst_46 : f32 to vector<8x128xf32>
    %101 = arith.maximumf %99, %100 : vector<8x128xf32>
    %c0_47 = arith.constant 0 : index
    %c0_48 = arith.constant 0 : index
    %102 = vector.load %arg4[%c0_47, %c0_48] : memref<128x128xf32, #tpu.memory_space<vmem>>, vector<128x128xf32>
    %cst_49 = arith.constant dense<0.000000e+00> : vector<8x128xf32>
    %103 = tpu.matmul %101, %102, %cst_49 {dimension_numbers = #tpu.dot_dimension_numbers<[1], [0], [0], [1], [0, 0, 1, 1], [], []>} : vector<8x128xf32>, vector<128x128xf32>, vector<8x128xf32> -> vector<8x128xf32>
    %c0_50 = arith.constant 0 : index
    %c0_51 = arith.constant 0 : index
    %104 = vector.load %arg5[%c0_50, %c0_51] : memref<1x128xf32, #tpu.memory_space<vmem>>, vector<1x128xf32>
    %105 = vector.broadcast %104 : vector<1x128xf32> to vector<8x128xf32>
    %106 = arith.addf %103, %105 : vector<8x128xf32>
    %cst_52 = arith.constant 0.000000e+00 : f32
    %107 = vector.broadcast %cst_52 : f32 to vector<8x128xf32>
    %108 = arith.maximumf %106, %107 : vector<8x128xf32>
    %cst_53 = arith.constant 0.000000e+00 : f32
    %109 = vector.broadcast %cst_53 : f32 to vector<1x128xf32>
    %c0_54 = arith.constant 0 : index
    %c0_55 = arith.constant 0 : index
    %110 = vector.load %arg12[%c0_54, %c0_55] : memref<10x128xf32, #tpu.memory_space<vmem>>, vector<1x128xf32>
    tpu.vector_store %arg12[%c0_54, %c0_55], %109 {strides = array<i32>} : memref<10x128xf32, #tpu.memory_space<vmem>>, vector<1x128xf32>,
    %c9_56 = arith.constant 9 : index
    %c0_57 = arith.constant 0 : index
    %111 = vector.load %arg12[%c9_56, %c0_57] : memref<10x128xf32, #tpu.memory_space<vmem>>, vector<1x128xf32>
    tpu.vector_store %arg12[%c9_56, %c0_57], %109 {strides = array<i32>} : memref<10x128xf32, #tpu.memory_space<vmem>>, vector<1x128xf32>,
    %c1_58 = arith.constant 1 : index
    %c0_59 = arith.constant 0 : index
    %112 = vector.load %arg12[%c1_58, %c0_59] : memref<10x128xf32, #tpu.memory_space<vmem>>, vector<8x128xf32>
    tpu.vector_store %arg12[%c1_58, %c0_59], %108 {strides = array<i32>} : memref<10x128xf32, #tpu.memory_space<vmem>>, vector<8x128xf32>,
    %c0_60 = arith.constant 0 : index
    %c0_61 = arith.constant 0 : index
    %c0_62 = arith.constant 0 : index
    %113 = vector.load %arg6[%c0_60, %c0_61, %c0_62] : memref<3x3x128xf32, #tpu.memory_space<vmem>>, vector<3x3x128xf32>
    %114 = tpu.iota {dimensions = array<i32: 1>} : vector<8x128xi32>
    %c16_i32_63 = arith.constant 16 : i32
    %115 = vector.broadcast %c16_i32_63 : i32 to vector<8x128xi32>
    %116 = arith.cmpi sge, %114, %115 : vector<8x128xi32>
    %c112_i32_64 = arith.constant 112 : i32
    %117 = vector.broadcast %c112_i32_64 : i32 to vector<8x128xi32>
    %118 = arith.cmpi slt, %114, %117 : vector<8x128xi32>
    %cst_65 = arith.constant 0.000000e+00 : f32
    %119 = vector.broadcast %cst_65 : f32 to vector<8x128xf32>
    %c0_66 = arith.constant 0 : index
    %c0_67 = arith.constant 0 : index
    %120 = vector.load %arg12[%c0_66, %c0_67] : memref<10x128xf32, #tpu.memory_space<vmem>>, vector<8x128xf32>
    %c16_i32_68 = arith.constant 16 : i32
    %121 = tpu.dynamic_rotate %120 by %c16_i32_68 dim 1 : vector<8x128xf32>, i32 -> vector<8x128xf32>
    %cst_69 = arith.constant 0.000000e+00 : f32
    %122 = vector.broadcast %cst_69 : f32 to vector<8x128xf32>
    %123 = arith.select %116, %121, %122 : vector<8x128xi1>, vector<8x128xf32>
    %c112_i32_70 = arith.constant 112 : i32
    %124 = tpu.dynamic_rotate %120 by %c112_i32_70 dim 1 : vector<8x128xf32>, i32 -> vector<8x128xf32>
    %cst_71 = arith.constant 0.000000e+00 : f32
    %125 = vector.broadcast %cst_71 : f32 to vector<8x128xf32>
    %126 = arith.select %118, %124, %125 : vector<8x128xi1>, vector<8x128xf32>
    %127 = vector.extract_strided_slice %113 {offsets = [0, 0, 0], sizes = [1, 1, 128], strides = [1, 1, 1]} : vector<3x3x128xf32> to vector<1x1x128xf32>
    %128 = vector.shape_cast %127 : vector<1x1x128xf32> to vector<128xf32>
    %129 = vector.shape_cast %128 : vector<128xf32> to vector<1x128xf32>
    %130 = vector.broadcast %129 : vector<1x128xf32> to vector<8x128xf32>
    %131 = arith.mulf %123, %130 : vector<8x128xf32>
    %132 = arith.addf %119, %131 : vector<8x128xf32>
    %133 = vector.extract_strided_slice %113 {offsets = [0, 1, 0], sizes = [1, 1, 128], strides = [1, 1, 1]} : vector<3x3x128xf32> to vector<1x1x128xf32>
    %134 = vector.shape_cast %133 : vector<1x1x128xf32> to vector<128xf32>
    %135 = vector.shape_cast %134 : vector<128xf32> to vector<1x128xf32>
    %136 = vector.broadcast %135 : vector<1x128xf32> to vector<8x128xf32>
    %137 = arith.mulf %120, %136 : vector<8x128xf32>
    %138 = arith.addf %132, %137 : vector<8x128xf32>
    %139 = vector.extract_strided_slice %113 {offsets = [0, 2, 0], sizes = [1, 1, 128], strides = [1, 1, 1]} : vector<3x3x128xf32> to vector<1x1x128xf32>
    %140 = vector.shape_cast %139 : vector<1x1x128xf32> to vector<128xf32>
    %141 = vector.shape_cast %140 : vector<128xf32> to vector<1x128xf32>
    %142 = vector.broadcast %141 : vector<1x128xf32> to vector<8x128xf32>
    %143 = arith.mulf %126, %142 : vector<8x128xf32>
    %144 = arith.addf %138, %143 : vector<8x128xf32>
    %c1_72 = arith.constant 1 : index
    %c0_73 = arith.constant 0 : index
    %145 = vector.load %arg12[%c1_72, %c0_73] : memref<10x128xf32, #tpu.memory_space<vmem>>, vector<8x128xf32>
    %c16_i32_74 = arith.constant 16 : i32
    %146 = tpu.dynamic_rotate %145 by %c16_i32_74 dim 1 : vector<8x128xf32>, i32 -> vector<8x128xf32>
    %cst_75 = arith.constant 0.000000e+00 : f32
    %147 = vector.broadcast %cst_75 : f32 to vector<8x128xf32>
    %148 = arith.select %116, %146, %147 : vector<8x128xi1>, vector<8x128xf32>
    %c112_i32_76 = arith.constant 112 : i32
    %149 = tpu.dynamic_rotate %145 by %c112_i32_76 dim 1 : vector<8x128xf32>, i32 -> vector<8x128xf32>
    %cst_77 = arith.constant 0.000000e+00 : f32
    %150 = vector.broadcast %cst_77 : f32 to vector<8x128xf32>
    %151 = arith.select %118, %149, %150 : vector<8x128xi1>, vector<8x128xf32>
    %152 = vector.extract_strided_slice %113 {offsets = [1, 0, 0], sizes = [1, 1, 128], strides = [1, 1, 1]} : vector<3x3x128xf32> to vector<1x1x128xf32>
    %153 = vector.shape_cast %152 : vector<1x1x128xf32> to vector<128xf32>
    %154 = vector.shape_cast %153 : vector<128xf32> to vector<1x128xf32>
    %155 = vector.broadcast %154 : vector<1x128xf32> to vector<8x128xf32>
    %156 = arith.mulf %148, %155 : vector<8x128xf32>
    %157 = arith.addf %144, %156 : vector<8x128xf32>
    %158 = vector.extract_strided_slice %113 {offsets = [1, 1, 0], sizes = [1, 1, 128], strides = [1, 1, 1]} : vector<3x3x128xf32> to vector<1x1x128xf32>
    %159 = vector.shape_cast %158 : vector<1x1x128xf32> to vector<128xf32>
    %160 = vector.shape_cast %159 : vector<128xf32> to vector<1x128xf32>
    %161 = vector.broadcast %160 : vector<1x128xf32> to vector<8x128xf32>
    %162 = arith.mulf %145, %161 : vector<8x128xf32>
    %163 = arith.addf %157, %162 : vector<8x128xf32>
    %164 = vector.extract_strided_slice %113 {offsets = [1, 2, 0], sizes = [1, 1, 128], strides = [1, 1, 1]} : vector<3x3x128xf32> to vector<1x1x128xf32>
    %165 = vector.shape_cast %164 : vector<1x1x128xf32> to vector<128xf32>
    %166 = vector.shape_cast %165 : vector<128xf32> to vector<1x128xf32>
    %167 = vector.broadcast %166 : vector<1x128xf32> to vector<8x128xf32>
    %168 = arith.mulf %151, %167 : vector<8x128xf32>
    %169 = arith.addf %163, %168 : vector<8x128xf32>
    %c2_78 = arith.constant 2 : index
    %c0_79 = arith.constant 0 : index
    %170 = vector.load %arg12[%c2_78, %c0_79] : memref<10x128xf32, #tpu.memory_space<vmem>>, vector<8x128xf32>
    %c16_i32_80 = arith.constant 16 : i32
    %171 = tpu.dynamic_rotate %170 by %c16_i32_80 dim 1 : vector<8x128xf32>, i32 -> vector<8x128xf32>
    %cst_81 = arith.constant 0.000000e+00 : f32
    %172 = vector.broadcast %cst_81 : f32 to vector<8x128xf32>
    %173 = arith.select %116, %171, %172 : vector<8x128xi1>, vector<8x128xf32>
    %c112_i32_82 = arith.constant 112 : i32
    %174 = tpu.dynamic_rotate %170 by %c112_i32_82 dim 1 : vector<8x128xf32>, i32 -> vector<8x128xf32>
    %cst_83 = arith.constant 0.000000e+00 : f32
    %175 = vector.broadcast %cst_83 : f32 to vector<8x128xf32>
    %176 = arith.select %118, %174, %175 : vector<8x128xi1>, vector<8x128xf32>
    %177 = vector.extract_strided_slice %113 {offsets = [2, 0, 0], sizes = [1, 1, 128], strides = [1, 1, 1]} : vector<3x3x128xf32> to vector<1x1x128xf32>
    %178 = vector.shape_cast %177 : vector<1x1x128xf32> to vector<128xf32>
    %179 = vector.shape_cast %178 : vector<128xf32> to vector<1x128xf32>
    %180 = vector.broadcast %179 : vector<1x128xf32> to vector<8x128xf32>
    %181 = arith.mulf %173, %180 : vector<8x128xf32>
    %182 = arith.addf %169, %181 : vector<8x128xf32>
    %183 = vector.extract_strided_slice %113 {offsets = [2, 1, 0], sizes = [1, 1, 128], strides = [1, 1, 1]} : vector<3x3x128xf32> to vector<1x1x128xf32>
    %184 = vector.shape_cast %183 : vector<1x1x128xf32> to vector<128xf32>
    %185 = vector.shape_cast %184 : vector<128xf32> to vector<1x128xf32>
    %186 = vector.broadcast %185 : vector<1x128xf32> to vector<8x128xf32>
    %187 = arith.mulf %170, %186 : vector<8x128xf32>
    %188 = arith.addf %182, %187 : vector<8x128xf32>
    %189 = vector.extract_strided_slice %113 {offsets = [2, 2, 0], sizes = [1, 1, 128], strides = [1, 1, 1]} : vector<3x3x128xf32> to vector<1x1x128xf32>
    %190 = vector.shape_cast %189 : vector<1x1x128xf32> to vector<128xf32>
    %191 = vector.shape_cast %190 : vector<128xf32> to vector<1x128xf32>
    %192 = vector.broadcast %191 : vector<1x128xf32> to vector<8x128xf32>
    %193 = arith.mulf %176, %192 : vector<8x128xf32>
    %194 = arith.addf %188, %193 : vector<8x128xf32>
    %c0_84 = arith.constant 0 : index
    %c0_85 = arith.constant 0 : index
    %195 = vector.load %arg7[%c0_84, %c0_85] : memref<1x128xf32, #tpu.memory_space<vmem>>, vector<1x128xf32>
    %196 = vector.broadcast %195 : vector<1x128xf32> to vector<8x128xf32>
    %197 = arith.addf %194, %196 : vector<8x128xf32>
    %cst_86 = arith.constant 0.000000e+00 : f32
    %198 = vector.broadcast %cst_86 : f32 to vector<8x128xf32>
    %199 = arith.maximumf %197, %198 : vector<8x128xf32>
    %c0_87 = arith.constant 0 : index
    %c0_88 = arith.constant 0 : index
    %200 = vector.load %arg8[%c0_87, %c0_88] : memref<128x128xf32, #tpu.memory_space<vmem>>, vector<128x128xf32>
    %cst_89 = arith.constant dense<0.000000e+00> : vector<8x128xf32>
    %201 = tpu.matmul %199, %200, %cst_89 {dimension_numbers = #tpu.dot_dimension_numbers<[1], [0], [0], [1], [0, 0, 1, 1], [], []>} : vector<8x128xf32>, vector<128x128xf32>, vector<8x128xf32> -> vector<8x128xf32>
    %c0_90 = arith.constant 0 : index
    %c0_91 = arith.constant 0 : index
    %202 = vector.load %arg9[%c0_90, %c0_91] : memref<1x128xf32, #tpu.memory_space<vmem>>, vector<1x128xf32>
    %203 = vector.broadcast %202 : vector<1x128xf32> to vector<8x128xf32>
    %204 = arith.addf %201, %203 : vector<8x128xf32>
    %cst_92 = arith.constant 0.000000e+00 : f32
    %205 = vector.broadcast %cst_92 : f32 to vector<8x128xf32>
    %206 = arith.maximumf %204, %205 : vector<8x128xf32>
    %c0_93 = arith.constant 0 : index
    %c0_94 = arith.constant 0 : index
    %c0_95 = arith.constant 0 : index
    %207 = vector.load %arg10[%c0_93, %c0_94, %c0_95] : memref<1x8x128xf32, #tpu.memory_space<vmem>>, vector<1x8x128xf32>
    %208 = vector.shape_cast %207 : vector<1x8x128xf32> to vector<8x128xf32>
    %209 = vector.shape_cast %206 : vector<8x128xf32> to vector<1x8x128xf32>
    tpu.vector_store %arg10[%c0_93, %c0_94, %c0_95], %209 {strides = array<i32>} : memref<1x8x128xf32, #tpu.memory_space<vmem>>, vector<1x8x128xf32>,
    return
  }
  func.func @transform_0(%arg0: i32) -> (i32, i32, i32, i32, i32) {
    %c0_i32 = arith.constant 0 : i32
    %c0_i32_0 = arith.constant 0 : i32
    %c0_i32_1 = arith.constant 0 : i32
    %c0_i32_2 = arith.constant 0 : i32
    %c0_i32_3 = arith.constant 0 : i32
    return %arg0, %c0_i32, %c0_i32_0, %c0_i32_1, %c0_i32_2 : i32, i32, i32, i32, i32
  }
  func.func @transform_1(%arg0: i32) -> (i32, i32, i32) {
    %c0_i32 = arith.constant 0 : i32
    %c0_i32_0 = arith.constant 0 : i32
    %c0_i32_1 = arith.constant 0 : i32
    %c0_i32_2 = arith.constant 0 : i32
    return %c0_i32, %c0_i32_0, %c0_i32_1 : i32, i32, i32
  }
  func.func @transform_2(%arg0: i32) -> (i32, i32) {
    %c0_i32 = arith.constant 0 : i32
    %c0_i32_0 = arith.constant 0 : i32
    %c0_i32_1 = arith.constant 0 : i32
    return %c0_i32, %c0_i32_0 : i32, i32
  }
  func.func @transform_3(%arg0: i32) -> (i32, i32) {
    %c0_i32 = arith.constant 0 : i32
    %c0_i32_0 = arith.constant 0 : i32
    %c0_i32_1 = arith.constant 0 : i32
    return %c0_i32, %c0_i32_0 : i32, i32
  }
  func.func @transform_4(%arg0: i32) -> (i32, i32) {
    %c0_i32 = arith.constant 0 : i32
    %c0_i32_0 = arith.constant 0 : i32
    %c0_i32_1 = arith.constant 0 : i32
    return %c0_i32, %c0_i32_0 : i32, i32
  }
  func.func @transform_5(%arg0: i32) -> (i32, i32, i32) {
    %c0_i32 = arith.constant 0 : i32
    %c0_i32_0 = arith.constant 0 : i32
    %c0_i32_1 = arith.constant 0 : i32
    %c0_i32_2 = arith.constant 0 : i32
    return %c0_i32, %c0_i32_0, %c0_i32_1 : i32, i32, i32
  }
  func.func @transform_6(%arg0: i32) -> (i32, i32) {
    %c0_i32 = arith.constant 0 : i32
    %c0_i32_0 = arith.constant 0 : i32
    %c0_i32_1 = arith.constant 0 : i32
    return %c0_i32, %c0_i32_0 : i32, i32
  }
  func.func @transform_7(%arg0: i32) -> (i32, i32) {
    %c0_i32 = arith.constant 0 : i32
    %c0_i32_0 = arith.constant 0 : i32
    %c0_i32_1 = arith.constant 0 : i32
    return %c0_i32, %c0_i32_0 : i32, i32
  }
  func.func @transform_8(%arg0: i32) -> (i32, i32) {
    %c0_i32 = arith.constant 0 : i32
    %c0_i32_0 = arith.constant 0 : i32
    %c0_i32_1 = arith.constant 0 : i32
    return %c0_i32, %c0_i32_0 : i32, i32
  }
  func.func @transform_9(%arg0: i32) -> (i32, i32, i32) {
    %c0_i32 = arith.constant 0 : i32
    %c0_i32_0 = arith.constant 0 : i32
    %c0_i32_1 = arith.constant 0 : i32
    return %arg0, %c0_i32, %c0_i32_0 : i32, i32, i32
  }
}

</mosaic_0001>

<bundles_post_ra>
// kernel: down_forward.1
= control target key start
LH: loop header
LB: loop body
LE: loop exit
PB: predicated region body
PF: predicated region fallthrough
CT: control target
= control target key end

     0   :  { %s1013_s30 = smov 0   ;;  %s1257_s0 = inlined_call_operand.vmem [shape: f32[2,2,2,8,128], index: 0, kind: input, shape index: {}]   ;;  %s1258_s1 = inlined_call_operand.vmem [shape: f32[3,3,128], index: 1, kind: input, shape index: {}]   ;;  %s1259_s2 = inlined_call_operand.vmem [shape: f32[1,128], index: 2, kind: input, shape index: {}]   ;;  %s1260_s3 = inlined_call_operand.vmem [shape: f32[128,128], index: 3, kind: input, shape index: {}]   ;;  %s1261_s4 = inlined_call_operand.vmem [shape: f32[1,128], index: 4, kind: input, shape index: {}]   ;;  %s1262_s5 = inlined_call_operand.vmem [shape: f32[3,3,128], index: 5, kind: input, shape index: {}]   ;;  %s1263_s6 = inlined_call_operand.vmem [shape: f32[1,128], index: 6, kind: input, shape index: {}]   ;;  %s1264_s7 = inlined_call_operand.vmem [shape: f32[128,128], index: 7, kind: input, shape index: {}]   ;;  %s1265_s8 = inlined_call_operand.vmem [shape: f32[1,128], index: 8, kind: input, shape index: {}]   ;;  %s1266_s9 = inlined_call_operand.vmem [shape: f32[2,8,128], index: 9, kind: output, shape index: {}]  }
   0x1 LB: > { %s767_s10 = sadd.s32 4294967295, %s956_s30   ;;  %p771_p0 = scmp.ge.s32.totalorder %s956_s30, 1  ;;  %s956_s30 = sphi %s1013_s30, %s19_s30  }
   0x2   : > { %p287_p1 = scmp.lt.s32.totalorder %s956_s30, 3 }
   0x4   : > { %p288_p2 = pnand %p771_p0, %p287_p1 }
   0x5   : > { %p322_p3 = scmp.lt.s32.totalorder (!%p288_p2), %s767_s10, 1  ;;  %v958_v0 = vmov (!%p288_p2), 0.0   ;;  %v959_v1 = vmov (!%p288_p2), 0.0|0.0   ;;  %v435_v2 = vld [vmem:[%s1260_s3] sm:$0xff] (!%p288_p2)  ;;  %v436_v3 = vld [vmem:[%s1260_s3 + $0x8] sm:$0xff] (!%p288_p2)  ;;  %v437_v4 = vld [vmem:[%s1260_s3 + $0x10] sm:$0xff] (!%p288_p2)  ;;  %v347_v35 = vlaneseq (!%p288_p2) }
   0x6   : > { %291 = sbr.rel (%p288_p2) target bundleno = 749 (0x2ed), region = 56  ;;  %341 = vst [vmem:[#allocation2] sm:$0x1] (!%p288_p2), %v958_v0  ;;  %342 = vst [vmem:[#allocation2 + $0x9] sm:$0x1] (!%p288_p2), %v958_v0  ;;  %889 = vmatprep.subr.bf16.mxu0 (!%p288_p2), %v959_v1  ;;  %913 = vmatprep.subr.bf16.mxu1 (!%p288_p2), %v959_v1  ;;  %v438_v5 = vld [vmem:[%s1260_s3 + $0x18] sm:$0xff] (!%p288_p2)  ;;  %v890_v6 = vpack.c.bf16 (!%p288_p2), %v436_v3, %v435_v2 }
   0x7   : > { %529 = vst [vmem:[#allocation3] sm:$0x1] (!%p288_p2), %v958_v0  ;;  %530 = vst [vmem:[#allocation3 + $0x9] sm:$0x1] (!%p288_p2), %v958_v0  ;;  %v893_v7 = vpack.c.bf16 (!%p288_p2), %v438_v5, %v437_v4  ;;  %v439_v13 = vld [vmem:[%s1260_s3 + $0x20] sm:$0xff] (!%p288_p2)  ;;  %v440_v14 = vld [vmem:[%s1260_s3 + $0x28] sm:$0xff] (!%p288_p2) }
   0x8   : > { %891 = vmatpush3.bf16.msra.mxu0 (!%p288_p2), %v890_v6  ;;  %v896_v16 = vpack.c.bf16 (!%p288_p2), %v440_v14, %v439_v13  ;;  %v441_v18 = vld [vmem:[%s1260_s3 + $0x30] sm:$0xff] (!%p288_p2)  ;;  %v442_v19 = vld [vmem:[%s1260_s3 + $0x38] sm:$0xff] (!%p288_p2)  ;;  %s960_s12 = smov (!%p288_p2), 16   ;;  %v443_v21 = vld [vmem:[%s1260_s3 + $0x40] sm:$0xff] (!%p288_p2)  ;;  %s961_s17 = smov (!%p288_p2), 112   ;;  %vm962_vm0 = vmmov (!%p288_p2), 0  }
   0x9   : > { %892 = vmatprep.subr.bf16.mxu0 (!%p288_p2), %v959_v1  ;;  %v899_v20 = vpack.c.bf16 (!%p288_p2), %v442_v19, %v441_v18  ;;  %v444_v22 = vld [vmem:[%s1260_s3 + $0x48] sm:$0xff] (!%p288_p2)  ;;  %v445_v24 = vld [vmem:[%s1260_s3 + $0x50] sm:$0xff] (!%p288_p2)  ;;  %v446_v25 = vld [vmem:[%s1260_s3 + $0x58] sm:$0xff] (!%p288_p2)  ;;  %851 = vmatprep.mubr.msk.f32.mxu0 (!%p288_p2), %vm962_vm0, %v958_v0  ;;  %v359_v36 = vshrl.u32 (!%p288_p2), %v347_v35, 7  ;;  %v1107_v38 = vand.u32 (!%p288_p2), 127, %v347_v35 }
   0xa   : > { %v902_v23 = vpack.c.bf16 (!%p288_p2), %v444_v22, %v443_v21  ;;  %v905_v28 = vpack.c.bf16 (!%p288_p2), %v446_v25, %v445_v24  ;;  %v447_v29 = vld [vmem:[%s1260_s3 + $0x60] sm:$0xff] (!%p288_p2)  ;;  %v448_v30 = vld [vmem:[%s1260_s3 + $0x68] sm:$0xff] (!%p288_p2)  ;;  %v449_v32 = vld [vmem:[%s1260_s3 + $0x70] sm:$0xff] (!%p288_p2)  ;;  %886 = vmatprep.mubr.msk.f32.mxu1 (!%p288_p2), %vm962_vm0, %v958_v0 }
   0xb   : > { %v908_v31 = vpack.c.bf16 (!%p288_p2), %v448_v30, %v447_v29  ;;  %v450_v33 = vld [vmem:[%s1260_s3 + $0x78] sm:$0xff] (!%p288_p2)  ;;  %v1105_v37 = vsub.s32 (!%p288_p2), 1, %v359_v36  ;;  %v1109_v39 = vsub.s32 (!%p288_p2), 0, %v359_v36  ;;  %v344_v40 = vld [vmem:[%s1258_s1] sm:$0x7] (!%p288_p2)  ;;  %vm349_vm1 = vcmp.ge.s32.totalorder (!%p288_p2), %v1107_v38, 16 }
   0xc   : > { %894 = vmatpush3.bf16.msra.mxu0 (!%p288_p2), %v893_v7  ;;  %v911_v34 = vpack.c.bf16 (!%p288_p2), %v450_v33, %v449_v32  ;;  %v1117_v43 = vsub.s32 (!%p288_p2), 2, %v359_v36  ;;  %v345_v45 = vld [vmem:[%s1258_s1 + $0x4] sm:$0x7] (!%p288_p2)  ;;  %vm350_vm2 = vcmp.lt.s32.totalorder (!%p288_p2), %v1107_v38, 112  ;;  %v346_v56 = vld [vmem:[%s1258_s1 + $0x8] sm:$0x7] (!%p288_p2) }
   0xd   : > { %s1268_s10 = smov (!%p322_p3, %s767_s10), 1  ;;  %895 = vmatprep.subr.bf16.mxu0 %v959_v1  ;;  %v367_v41 = vrot.slane %v344_v40, %v1105_v37  ;;  %v361_v42 = vrot.slane %v344_v40, %v1109_v39  ;;  %v386_v51 = vrot.slane %v345_v45, %v1109_v39  ;;  %v392_v53 = vrot.slane %v345_v45, %v1105_v37  ;;  %v778_v18 = vld [vmem:[%s1259_s2] ss:$0 sm:$0xff]  ;;  %v621_v24 = vld [vmem:[%s1264_s7 + $0x10] sm:$0xff]  ;;  %v624_v29 = vld [vmem:[%s1264_s7 + $0x28] sm:$0xff] }
   0xe   : > { %s784_s19 = sshll.u32 %s1268_s10, 5  ;;  %v373_v50 = vrot.slane %v344_v40, %v1117_v43  ;;  %v398_v61 = vrot.slane %v345_v45, %v1117_v43  ;;  %v411_v2 = vrot.slane %v346_v56, %v1109_v39  ;;  %v417_v5 = vrot.slane %v346_v56, %v1105_v37  ;;  %v619_v22 = vld [vmem:[%s1264_s7] sm:$0xff]  ;;  %v625_v35 = vld [vmem:[%s1264_s7 + $0x30] sm:$0xff]  ;;  %v626_v36 = vld [vmem:[%s1264_s7 + $0x38] sm:$0xff]  ;;  %s774_s29 = sshll.u32 %s1268_s10, 3 }
   0xf   : > { %s326_s22 = scalar_lea.vmem %s1257_s0, %s784_s19  ;;  %v779_v30 = vld [vmem:[%s1261_s4] ss:$0 sm:$0xff]  ;;  %v923_v40 = vpack.c.bf16 %v626_v36, %v625_v35  ;;  %s330_s14 = scalar_lea.vmem %s1266_s9, %s774_s29 }
  0x10   : > { %v331_v8 = vld [vmem:[%s326_s22] sm:$0xff]  ;;  %v775_v9 = vld [vmem:[%s326_s22 + $0x8] sm:$0xff]  ;;  %v776_v10 = vld [vmem:[%s326_s22 + $0x10] sm:$0xff]  ;;  %897 = vmatpush3.bf16.msra.mxu0 %v896_v16 }
  0x11   : > { %v777_v11 = vld [vmem:[%s326_s22 + $0x18] sm:$0xff]  ;;  %v338_v12 = vmax.f32 %v331_v8, %v775_v9  ;;  %898 = vmatprep.subr.bf16.mxu0 %v959_v1 }
  0x12   : > { %v339_v15 = vmax.f32 %v776_v10, %v777_v11  ;;  %v423_v11 = vrot.slane %v346_v56, %v1117_v43 }
  0x14   : > { %v1052_v17 = vmax.f32 %v338_v12, %v339_v15  ;;  %900 = vmatpush3.bf16.msra.mxu0 %v899_v20 }
  0x15   : > { %901 = vmatprep.subr.bf16.mxu0 %v959_v1 }
  0x16   : > { %343 = vst [vmem:[#allocation2 + $0x1] sm:$0xff] %v1052_v17  ;;  %377 = vrot.lane.b32.xlu1 %v1052_v17, %s960_s12  ;;  %v393_v63 = vmul.f32 %v392_v53, %v1052_v17  ;;  %v633_v53 = vld [vmem:[%s1264_s7 + $0x70] sm:$0xff] }
  0x18   : > { %903 = vmatpush3.bf16.msra.mxu0 %v902_v23  ;;  %v620_v23 = vld [vmem:[%s1264_s7 + $0x8] sm:$0xff] }
  0x19   : > { %904 = vmatprep.subr.bf16.mxu0 %v959_v1  ;;  %v914_v25 = vpack.c.bf16 %v620_v23, %v619_v22 }
  0x1a   : > { %380 = vrot.lane.b32.xlu1 %v1052_v17, %s961_s17 }
  0x1b   : > { %915 = vmatpush3.bf16.msra.mxu1 %v914_v25 }
  0x1c   : > { %906 = vmatpush3.bf16.msra.mxu0 %v905_v28  ;;  %916 = vmatprep.subr.bf16.mxu1 %v959_v1  ;;  %v623_v28 = vld [vmem:[%s1264_s7 + $0x20] sm:$0xff] }
  0x1d   : > { %v351_v26 = vld [vmem:[#allocation2] sm:$0xff]  ;;  %907 = vmatprep.subr.bf16.mxu0 %v959_v1 }
  0x1e   : > { %v1080_v27 = vld [vmem:[#allocation2 + $0x2] sm:$0xff]  ;;  %352 = vrot.lane.b32.xlu0 %v351_v26, %s960_s12  ;;  %v368_v48 = vmul.f32 %v367_v41, %v351_v26 }
  0x1f   : > { %405 = vrot.lane.b32.xlu1 %v1080_v27, %s961_s17  ;;  %v418_v13 = vmul.f32 %v417_v5, %v1080_v27 }
  0x20   : > { %909 = vmatpush3.bf16.msra.mxu0 %v908_v31  ;;  %v920_v31 = vpack.c.bf16 %v624_v29, %v623_v28 }
  0x21   : > { %910 = vmatprep.subr.bf16.mxu0 %v959_v1 }
  0x22   : > { %355 = vrot.lane.b32.xlu0 %v351_v26, %s961_s17  ;;  %v622_v26 = vld [vmem:[%s1264_s7 + $0x18] sm:$0xff] }
  0x24   : > { %912 = vmatpush3.bf16.msra.mxu0 %v911_v34 }
  0x26   : > { %402 = vrot.lane.b32.xlu0 %v1080_v27, %s960_s12  ;;  %v917_v27 = vpack.c.bf16 %v622_v26, %v621_v24 }
  0x28   : > { %918 = vmatpush3.bf16.msra.mxu1 %v917_v27 }
  0x29   : > { %919 = vmatprep.subr.bf16.mxu1 %v959_v1 }
  0x2c   : > { %921 = vmatpush3.bf16.msra.mxu1 %v920_v31 }
  0x2d   : > { %922 = vmatprep.subr.bf16.mxu1 %v959_v1 }
  0x30   : > { %924 = vmatpush3.bf16.msra.mxu1 %v923_v40 }
  0x31   : > { %925 = vmatprep.subr.bf16.mxu1 %v959_v1 }
  0x88   : > { %v378_v44 = vpop.permute.xlu1 %377 }
  0x89   : > { %v379_v52 = vsel %vm349_vm1, %v378_v44, 0.0  ;;  %v628_v44 = vld [vmem:[%s1264_s7 + $0x48] sm:$0xff] }
  0x8a   : > { %v387_v60 = vmul.f32 %v386_v51, %v379_v52  ;;  %v632_v51 = vld [vmem:[%s1264_s7 + $0x68] sm:$0xff] }
  0x8c   : > { %v381_v55 = vpop.permute.xlu1 %380 }
  0x8d   : > { %v382_v62 = vsel %vm350_vm2, %v381_v55, 0.0 }
  0x8e   : > { %v399_v7 = vmul.f32 %v398_v61, %v382_v62 }
  0x90   : > { %v353_v46 = vpop.permute.xlu0 %352 }
  0x91   : > { %v354_v47 = vsel %vm349_vm1, %v353_v46, 0.0  ;;  %v406_v8 = vpop.permute.xlu1 %405  ;;  %v629_v46 = vld [vmem:[%s1264_s7 + $0x50] sm:$0xff] }
  0x92   : > { %v362_v49 = vmul.f32 %v361_v42, %v354_v47  ;;  %v407_v12 = vsel %vm350_vm2, %v406_v8, 0.0  ;;  %v627_v42 = vld [vmem:[%s1264_s7 + $0x40] sm:$0xff]  ;;  %v630_v47 = vld [vmem:[%s1264_s7 + $0x58] sm:$0xff] }
  0x93   : > { %v424_v16 = vmul.f32 %v423_v11, %v407_v12  ;;  %v926_v45 = vpack.c.bf16 %v628_v44, %v627_v42 }
  0x94   : > { %v356_v54 = vpop.permute.xlu0 %355  ;;  %v369_v58 = vadd.f32 %v368_v48, %v362_v49  ;;  %v929_v48 = vpack.c.bf16 %v630_v47, %v629_v46 }
  0x95   : > { %v357_v57 = vsel %vm350_vm2, %v356_v54, 0.0  ;;  %927 = vmatpush3.bf16.msra.mxu1 %v926_v45  ;;  %v634_v54 = vld [vmem:[%s1264_s7 + $0x78] sm:$0xff] }
  0x96   : > { %v374_v59 = vmul.f32 %v373_v50, %v357_v57  ;;  %928 = vmatprep.subr.bf16.mxu1 %v959_v1  ;;  %v631_v50 = vld [vmem:[%s1264_s7 + $0x60] sm:$0xff]  ;;  %v935_v55 = vpack.c.bf16 %v634_v54, %v633_v53 }
  0x97   : > { %v932_v52 = vpack.c.bf16 %v632_v51, %v631_v50  ;;  %v532_v57 = vld [vmem:[%s1262_s5] sm:$0x7] }
  0x98   : > { %v375_v0 = vadd.f32 %v374_v59, %v369_v58  ;;  %v403_v3 = vpop.permute.xlu0 %402  ;;  %v551_v58 = vrot.slane %v532_v57, %v1105_v37  ;;  %v545_v59 = vrot.slane %v532_v57, %v1109_v39 }
  0x99   : > { %v404_v4 = vsel %vm349_vm1, %v403_v3, 0.0  ;;  %930 = vmatpush3.bf16.msra.mxu1 %v929_v48 }
  0x9a   : > { %v388_v6 = vadd.f32 %v387_v60, %v375_v0  ;;  %v412_v10 = vmul.f32 %v411_v2, %v404_v4  ;;  %931 = vmatprep.subr.bf16.mxu1 %v959_v1  ;;  %v557_v60 = vrot.slane %v532_v57, %v1117_v43 }
  0x9c   : > { %v394_v9 = vadd.f32 %v393_v63, %v388_v6 }
  0x9d   : > { %933 = vmatpush3.bf16.msra.mxu1 %v932_v52 }
  0x9e   : > { %v400_v14 = vadd.f32 %v399_v7, %v394_v9  ;;  %934 = vmatprep.subr.bf16.mxu1 %v959_v1  ;;  %v533_v1 = vld [vmem:[%s1262_s5 + $0x4] sm:$0x7] }
  0x9f   : > { %v570_v4 = vrot.slane %v533_v1, %v1109_v39  ;;  %v576_v5 = vrot.slane %v533_v1, %v1105_v37  ;;  %v582_v11 = vrot.slane %v533_v1, %v1117_v43 }
  0xa0   : > { %v413_v15 = vadd.f32 %v412_v10, %v400_v14  ;;  %v534_v14 = vld [vmem:[%s1262_s5 + $0x8] sm:$0x7] }
  0xa1   : > { %936 = vmatpush3.bf16.msra.mxu1 %v935_v55  ;;  %v607_v25 = vrot.slane %v534_v14, %v1117_v43  ;;  %v781_v43 = vld [vmem:[%s1265_s8] ss:$0 sm:$0xff] }
  0xa2   : > { %v419_v17 = vadd.f32 %v418_v13, %v413_v15 }
  0xa4   : > { %v425_v19 = vadd.f32 %v424_v16, %v419_v17 }
  0xa6   : > { %v433_v20 = vadd.f32 %v778_v18, %v425_v19  ;;  %v595_v18 = vrot.slane %v534_v14, %v1109_v39 }
  0xa8   : > { %v434_v21 = vmax.f32 %v433_v20, 0.0 }
  0xaa   : > { %852 = vmatmul.mubr.f32.vlgmr.msra.gmra.mrb[0].mxu0 %v434_v21  ;;  %v601_v21 = vrot.slane %v534_v14, %v1105_v37 }
 0x17d   : > { %v524_v32 = vpop.f32.mrb[0].mxu0 }
 0x17e   : > { %v525_v33 = vadd.f32 %v779_v30, %v524_v32  ;;  %v853_v34 = vpop.f32.mrb[1].mxu0  ;;  %v780_v32 = vld [vmem:[%s1263_s6] ss:$0 sm:$0xff] }
 0x180   : > { %v528_v41 = vmax.f32 %v525_v33, 0.0 }
 0x182   : > { %531 = vst [vmem:[#allocation3 + $0x1] sm:$0xff] %v528_v41  ;;  %v577_v16 = vmul.f32 %v576_v5, %v528_v41 }
 0x189   : > { %v535_v49 = vld [vmem:[#allocation3] sm:$0xff] }
 0x18a   : > { %539 = vrot.lane.b32.xlu1 %v535_v49, %s961_s17  ;;  %536 = vrot.lane.b32.xlu0 %v535_v49, %s960_s12  ;;  %v585_v56 = vld [vmem:[#allocation3 + $0x2] sm:$0xff]  ;;  %v552_v2 = vmul.f32 %v551_v58, %v535_v49 }
 0x18b   : > { %v602_v29 = vmul.f32 %v601_v21, %v585_v56 }
 0x18e   : > { %564 = vrot.lane.b32.xlu1 %v528_v41, %s961_s17  ;;  %561 = vrot.lane.b32.xlu0 %v528_v41, %s960_s12 }
 0x192   : > { %589 = vrot.lane.b32.xlu1 %v585_v56, %s961_s17  ;;  %586 = vrot.lane.b32.xlu0 %v585_v56, %s960_s12 }
 0x1fc   : > { %v540_v61 = vpop.permute.xlu1 %539  ;;  %v537_v62 = vpop.permute.xlu0 %536 }
 0x1fd   : > { %v541_v63 = vsel %vm350_vm2, %v540_v61, 0.0  ;;  %v538_v0 = vsel %vm349_vm1, %v537_v62, 0.0 }
 0x1fe   : > { %v546_v3 = vmul.f32 %v545_v59, %v538_v0  ;;  %v558_v6 = vmul.f32 %v557_v60, %v541_v63 }
 0x200   : > { %v553_v7 = vadd.f32 %v552_v2, %v546_v3  ;;  %v565_v8 = vpop.permute.xlu1 %564  ;;  %v562_v9 = vpop.permute.xlu0 %561 }
 0x201   : > { %v563_v10 = vsel %vm349_vm1, %v562_v9, 0.0  ;;  %v566_v15 = vsel %vm350_vm2, %v565_v8, 0.0 }
 0x202   : > { %v559_v12 = vadd.f32 %v558_v6, %v553_v7  ;;  %v571_v13 = vmul.f32 %v570_v4, %v563_v10  ;;  %v583_v22 = vmul.f32 %v582_v11, %v566_v15 }
 0x204   : > { %v572_v17 = vadd.f32 %v571_v13, %v559_v12  ;;  %v587_v19 = vpop.permute.xlu0 %586  ;;  %v590_v24 = vpop.permute.xlu1 %589 }
 0x205   : > { %v588_v20 = vsel %vm349_vm1, %v587_v19, 0.0  ;;  %v591_v28 = vsel %vm350_vm2, %v590_v24, 0.0 }
 0x206   : > { %v578_v23 = vadd.f32 %v577_v16, %v572_v17  ;;  %v596_v27 = vmul.f32 %v595_v18, %v588_v20  ;;  %v608_v39 = vmul.f32 %v607_v25, %v591_v28 }
 0x208   : > { %v584_v26 = vadd.f32 %v583_v22, %v578_v23 }
 0x20a   : > { %v597_v30 = vadd.f32 %v596_v27, %v584_v26 }
 0x20c   : > { %v603_v31 = vadd.f32 %v602_v29, %v597_v30 }
 0x20e   : > { %v609_v37 = vadd.f32 %v608_v39, %v603_v31 }
 0x210   : > { %v617_v33 = vadd.f32 %v780_v32, %v609_v37 }
 0x212   : > { %v618_v34 = vmax.f32 %v617_v33, 0.0 }
 0x214   : > { %887 = vmatmul.mubr.f32.vlgmr.msra.gmra.mrb[0].mxu1 %v618_v34 }
 0x2e7   : > { %v708_v35 = vpop.f32.mrb[0].mxu1 }
 0x2e8   : > { %v709_v38 = vadd.f32 %v781_v43, %v708_v35  ;;  %v888_v36 = vpop.f32.mrb[1].mxu1 }
 0x2ea   : > { %v712_v40 = vmax.f32 %v709_v38, 0.0 }
 0x2ec   : > { %713 = vst [vmem:[%s330_s14] sm:$0xff] %v712_v40 }
 0x2ed PF: > { %s19_s30 = sadd.s32 1, %s956_s30  }
 0x2ee   : > { %p16_p4 = scmp.ge.s32.totalorder %s19_s30, 4  }
 0x2f0   :  { %18 = sbr.rel (!%p16_p4) target bundleno = 1 (0x1), region = 89 }

</bundles_post_ra>
